<compile_context>
chip_gen: v5e
topology: v5e:2x2
jax: 0.10.0
libtpu: 0.0.40
codegen_flags: <defaults>
</compile_context>

<pallas_src>
import jax
import jax.numpy as jnp
from jax.experimental import pallas as pl
from jax.experimental.pallas import tpu as pltpu


LANE = 128


def _round_up(n: int, m: int) -> int:
    return ((n + m - 1) // m) * m


# ---------------------------------------------------------------------------
# Fused MLP kernel
# ---------------------------------------------------------------------------
def _make_mlp_kernel(n_layers: int, out_dim: int):
    """Kernel computing the full MLP on one (TB, in) activation tile.

    Ref layout: (x_ref, w1, b1, w2, b2, ..., wn, bn, o_ref).
    Intermediates stay in vregs/VMEM (128-lane padded); only the true
    out_dim-wide slice of the final tile is stored.
    """

    def kernel(x_ref, *refs):
        o_ref = refs[-1]
        h = x_ref[...]                                  # (TB, K_in) f32
        for li in range(n_layers):
            w = refs[2 * li][...]                       # (K, Np)  bf16
            b = refs[2 * li + 1][...]                   # (1, Np)  f32
            # bf16 operands on the MXU, f32 accumulation; bias/ReLU in f32.
            h = jnp.dot(h.astype(w.dtype), w,
                        preferred_element_type=jnp.float32) + b
            if li < n_layers - 1:                       # hidden layers -> ReLU
                h = jnp.maximum(h, 0.0)
        # Store only the true output columns (HBM output stays out_dim wide).
        o_ref[...] = h[:, :out_dim].astype(o_ref.dtype)

    return kernel


def _pick_tile(batch: int, tb_target: int) -> int:
    """Batch tile: multiple of 8, as large as possible (amortize ~0.35 us/step),
    but capped at ceil(B/2) rounded up to 8 so v7x's two TensorCores both get
    at least one tile whenever the batch allows."""
    half = _round_up(-(-batch // 2), 8)
    return max(8, min(tb_target, half))


def mlp_forward(prepped, x: jax.Array, *, tb: int = 512) -> jax.Array:
    """Fused MLP forward.

    prepped: (layers, out_dim) from prepare_params; layers is a list of
             (w_t, b2) with w_t (in_pad, out_pad) bf16 and b2 (1, out_pad) f32.
    x:       (B, in_channels) float32 (unpadded).
    tb:      target batch tile (multiple of 8); default 512.
    """
    layers, out_dim = prepped
    B, K = x.shape
    n_layers = len(layers)

    tb = _pick_tile(B, tb)
    n_tiles = pl.cdiv(B, tb)   # ragged last tile: masked writes, no wrapper pad

    in_specs = [pl.BlockSpec((tb, K), lambda i: (i, 0))]
    flat_params = []
    for w_t, b2 in layers:
        kw, nw = w_t.shape
        # Whole weight/bias per step, constant index_map -> VMEM-resident.
        in_specs.append(pl.BlockSpec((kw, nw), lambda i: (0, 0)))
        in_specs.append(pl.BlockSpec((1, nw), lambda i: (0, 0)))
        flat_params.extend([w_t, b2])

    return pl.pallas_call(
        _make_mlp_kernel(n_layers, out_dim),
        out_shape=jax.ShapeDtypeStruct((B, out_dim), jnp.float32),
        grid_spec=pl.GridSpec(
            grid=(n_tiles,),
            in_specs=in_specs,
            out_specs=pl.BlockSpec((tb, out_dim), lambda i: (i, 0)),
        ),
        compiler_params=pltpu.CompilerParams(
            dimension_semantics=("parallel",)),   # shard batch over v7x's 2 TCs
    )(x, *flat_params)


# ---------------------------------------------------------------------------
# Param init (PyTorch convention) + one-time layout prep
# ---------------------------------------------------------------------------
def init_mlp_params(key, in_channels: int, out_channels: int,
                    hidden_layers: tuple, gain: float = 1.0):
    """Deterministic synthetic init matching the module's layer shapes.

    Mimics init_param(nn.Linear(...), gain): Xavier-style weight init scaled by
    `gain`, zero bias.  Weights stored in PyTorch convention (out, in), f32.
    """
    params = []
    units = in_channels
    for next_units in tuple(hidden_layers) + (out_channels,):
        key, wk = jax.random.split(key)
        scale = gain * jnp.sqrt(2.0 / (units + next_units))
        w = scale * jax.random.normal(wk, (next_units, units), dtype=jnp.float32)
        b = jnp.zeros((next_units,), dtype=jnp.float32)
        params.append((w, b))
        units = next_units
    return params


def prepare_params(params, *, matmul_dtype=jnp.bfloat16):
    """One-time layout prep (zero per-forward transposes / reshapes / pads).

      * (out, in) PyTorch weights -> (in, out); out widths (and in widths of
        every layer past the first) zero-padded up to a multiple of 128 lanes
        so intermediate activations fill whole vregs.  Layer-0 in width is left
        unpadded to match x straight from HBM.
      * Weights cast to `matmul_dtype` (bf16) once.  Biases stay f32 and are
        zero-padded, so padded activation columns are exactly 0 after ReLU.

    Returns (layers, out_dim) with layers = [(w_t, b2), ...].
    """
    out_dim = params[-1][0].shape[0]
    layers = []
    prev_padded = None
    for li, (w, b) in enumerate(params):
        n_out, n_in = w.shape
        in_w = n_in if li == 0 else prev_padded
        out_w = _round_up(n_out, LANE)
        w_t = jnp.zeros((in_w, out_w), dtype=jnp.float32)
        w_t = w_t.at[:n_in, :n_out].set(jnp.transpose(w))
        b2 = jnp.zeros((1, out_w), dtype=jnp.float32)
        b2 = b2.at[0, :n_out].set(b)
        layers.append((w_t.astype(matmul_dtype), b2))
        prev_padded = out_w
    return layers, out_dim


# ---------------------------------------------------------------------------
# Pure-JAX reference (same math as the PyTorch module's forward), f32
# ---------------------------------------------------------------------------
def mlp_reference(params, x: jax.Array) -> jax.Array:
    h = x
    n_layers = len(params)
    for li, (w, b) in enumerate(params):
        h = h @ w.T + b
        if li < n_layers - 1:
            h = jnp.maximum(h, 0.0)
    return h


# TODO(synk): spectral_norm (limit_lip=True) is a training-time weight
# re-normalization; at inference it is just a different weight value, so the
# forward math here is unchanged.

if __name__ == "__main__":
    key = jax.random.PRNGKey(0)
    key, xk, pk = jax.random.split(key, 3)

    # MLP(in_channels=32, out_channels=16, hidden_layers=(64, 64))
    in_channels, out_channels = 32, 16
    hidden_layers = (64, 64)

    params = init_mlp_params(pk, in_channels, out_channels, hidden_layers, gain=1.0)
    prepped = prepare_params(params)   # one-time layout plumbing (pad + bf16)

    # Two batches: one dividing the tile evenly, one exercising the ragged
    # last-tile path (no wrapper pad/slice anymore).
    for batch in (32, 37):
        xb = jax.random.normal(jax.random.fold_in(xk, batch),
                               (batch, in_channels), dtype=jnp.float32)
        out = jax.block_until_ready(mlp_forward(prepped, xb))
        ref = mlp_reference(params, xb)
        assert out.shape == (batch, out_channels), out.shape
        # bf16 MXU operands (f32 accumulation): tolerance loosened per review.
        assert jnp.allclose(out, ref, atol=5e-2, rtol=5e-2), "mismatch vs reference"

    print("KERNEL_OK")
</pallas_src>

<mosaic_0001>
module attributes {stable_mosaic.version = 11 : i64} {
  func.func @kernel(%arg0: i32, %arg1: memref<16x32xf32, #tpu.memory_space<vmem>>, %arg2: memref<32x128xbf16, #tpu.memory_space<vmem>>, %arg3: memref<1x128xf32, #tpu.memory_space<vmem>>, %arg4: memref<128x128xbf16, #tpu.memory_space<vmem>>, %arg5: memref<1x128xf32, #tpu.memory_space<vmem>>, %arg6: memref<128x128xbf16, #tpu.memory_space<vmem>>, %arg7: memref<1x128xf32, #tpu.memory_space<vmem>>, %arg8: memref<16x16xf32, #tpu.memory_space<vmem>>) attributes {dimension_semantics = [#tpu.dimension_semantics<parallel>], iteration_bounds = array<i64: 2>, scalar_prefetch = 0 : i64, scratch_operands = 0 : i64, tpu.core_type = #tpu.core_type<tc>, window_params = [{transform_indices = @transform_0, window_bounds = array<i64: 16, 32>}, {pipeline_mode = #tpu.pipeline_mode<synchronous>, transform_indices = @transform_1, window_bounds = array<i64: 32, 128>}, {pipeline_mode = #tpu.pipeline_mode<synchronous>, transform_indices = @transform_2, window_bounds = array<i64: 1, 128>}, {pipeline_mode = #tpu.pipeline_mode<synchronous>, transform_indices = @transform_3, window_bounds = array<i64: 128, 128>}, {pipeline_mode = #tpu.pipeline_mode<synchronous>, transform_indices = @transform_4, window_bounds = array<i64: 1, 128>}, {pipeline_mode = #tpu.pipeline_mode<synchronous>, transform_indices = @transform_5, window_bounds = array<i64: 128, 128>}, {pipeline_mode = #tpu.pipeline_mode<synchronous>, transform_indices = @transform_6, window_bounds = array<i64: 1, 128>}, {transform_indices = @transform_7, window_bounds = array<i64: 16, 16>}]} {
    %c0 = arith.constant 0 : index
    %c0_0 = arith.constant 0 : index
    %0 = vector.load %arg1[%c0, %c0_0] : memref<16x32xf32, #tpu.memory_space<vmem>>, vector<16x32xf32>
    %c0_1 = arith.constant 0 : index
    %c0_2 = arith.constant 0 : index
    %1 = vector.load %arg2[%c0_1, %c0_2] : memref<32x128xbf16, #tpu.memory_space<vmem>>, vector<32x128xbf16>
    %c0_3 = arith.constant 0 : index
    %c0_4 = arith.constant 0 : index
    %2 = vector.load %arg3[%c0_3, %c0_4] : memref<1x128xf32, #tpu.memory_space<vmem>>, vector<1x128xf32>
    %3 = arith.truncf %0 : vector<16x32xf32> to vector<16x32xbf16>
    %cst = arith.constant dense<0.000000e+00> : vector<16x128xf32>
    %4 = tpu.matmul %3, %1, %cst {dimension_numbers = #tpu.dot_dimension_numbers<[1], [0], [0], [1], [0, 0, 1, 1], [], []>} : vector<16x32xbf16>, vector<32x128xbf16>, vector<16x128xf32> -> vector<16x128xf32>
    %5 = vector.broadcast %2 : vector<1x128xf32> to vector<16x128xf32>
    %6 = arith.addf %4, %5 : vector<16x128xf32>
    %cst_5 = arith.constant 0.000000e+00 : f32
    %7 = vector.broadcast %cst_5 : f32 to vector<16x128xf32>
    %8 = arith.maximumf %6, %7 : vector<16x128xf32>
    %c0_6 = arith.constant 0 : index
    %c0_7 = arith.constant 0 : index
    %9 = vector.load %arg4[%c0_6, %c0_7] : memref<128x128xbf16, #tpu.memory_space<vmem>>, vector<128x128xbf16>
    %c0_8 = arith.constant 0 : index
    %c0_9 = arith.constant 0 : index
    %10 = vector.load %arg5[%c0_8, %c0_9] : memref<1x128xf32, #tpu.memory_space<vmem>>, vector<1x128xf32>
    %11 = arith.truncf %8 : vector<16x128xf32> to vector<16x128xbf16>
    %cst_10 = arith.constant dense<0.000000e+00> : vector<16x128xf32>
    %12 = tpu.matmul %11, %9, %cst_10 {dimension_numbers = #tpu.dot_dimension_numbers<[1], [0], [0], [1], [0, 0, 1, 1], [], []>} : vector<16x128xbf16>, vector<128x128xbf16>, vector<16x128xf32> -> vector<16x128xf32>
    %13 = vector.broadcast %10 : vector<1x128xf32> to vector<16x128xf32>
    %14 = arith.addf %12, %13 : vector<16x128xf32>
    %cst_11 = arith.constant 0.000000e+00 : f32
    %15 = vector.broadcast %cst_11 : f32 to vector<16x128xf32>
    %16 = arith.maximumf %14, %15 : vector<16x128xf32>
    %c0_12 = arith.constant 0 : index
    %c0_13 = arith.constant 0 : index
    %17 = vector.load %arg6[%c0_12, %c0_13] : memref<128x128xbf16, #tpu.memory_space<vmem>>, vector<128x128xbf16>
    %c0_14 = arith.constant 0 : index
    %c0_15 = arith.constant 0 : index
    %18 = vector.load %arg7[%c0_14, %c0_15] : memref<1x128xf32, #tpu.memory_space<vmem>>, vector<1x128xf32>
    %19 = arith.truncf %16 : vector<16x128xf32> to vector<16x128xbf16>
    %cst_16 = arith.constant dense<0.000000e+00> : vector<16x128xf32>
    %20 = tpu.matmul %19, %17, %cst_16 {dimension_numbers = #tpu.dot_dimension_numbers<[1], [0], [0], [1], [0, 0, 1, 1], [], []>} : vector<16x128xbf16>, vector<128x128xbf16>, vector<16x128xf32> -> vector<16x128xf32>
    %21 = vector.broadcast %18 : vector<1x128xf32> to vector<16x128xf32>
    %22 = arith.addf %20, %21 : vector<16x128xf32>
    %23 = vector.extract_strided_slice %22 {offsets = [0, 0], sizes = [16, 16], strides = [1, 1]} : vector<16x128xf32> to vector<16x16xf32>
    %c0_17 = arith.constant 0 : index
    %c0_18 = arith.constant 0 : index
    %24 = vector.load %arg8[%c0_17, %c0_18] : memref<16x16xf32, #tpu.memory_space<vmem>>, vector<16x16xf32>
    tpu.vector_store %arg8[%c0_17, %c0_18], %23 {strides = array<i32>} : memref<16x16xf32, #tpu.memory_space<vmem>>, vector<16x16xf32>,
    return
  }
  func.func @transform_0(%arg0: i32) -> (i32, i32) {
    %c0_i32 = arith.constant 0 : i32
    %c0_i32_0 = arith.constant 0 : i32
    return %arg0, %c0_i32 : i32, i32
  }
  func.func @transform_1(%arg0: i32) -> (i32, i32) {
    %c0_i32 = arith.constant 0 : i32
    %c0_i32_0 = arith.constant 0 : i32
    %c0_i32_1 = arith.constant 0 : i32
    return %c0_i32, %c0_i32_0 : i32, i32
  }
  func.func @transform_2(%arg0: i32) -> (i32, i32) {
    %c0_i32 = arith.constant 0 : i32
    %c0_i32_0 = arith.constant 0 : i32
    %c0_i32_1 = arith.constant 0 : i32
    return %c0_i32, %c0_i32_0 : i32, i32
  }
  func.func @transform_3(%arg0: i32) -> (i32, i32) {
    %c0_i32 = arith.constant 0 : i32
    %c0_i32_0 = arith.constant 0 : i32
    %c0_i32_1 = arith.constant 0 : i32
    return %c0_i32, %c0_i32_0 : i32, i32
  }
  func.func @transform_4(%arg0: i32) -> (i32, i32) {
    %c0_i32 = arith.constant 0 : i32
    %c0_i32_0 = arith.constant 0 : i32
    %c0_i32_1 = arith.constant 0 : i32
    return %c0_i32, %c0_i32_0 : i32, i32
  }
  func.func @transform_5(%arg0: i32) -> (i32, i32) {
    %c0_i32 = arith.constant 0 : i32
    %c0_i32_0 = arith.constant 0 : i32
    %c0_i32_1 = arith.constant 0 : i32
    return %c0_i32, %c0_i32_0 : i32, i32
  }
  func.func @transform_6(%arg0: i32) -> (i32, i32) {
    %c0_i32 = arith.constant 0 : i32
    %c0_i32_0 = arith.constant 0 : i32
    %c0_i32_1 = arith.constant 0 : i32
    return %c0_i32, %c0_i32_0 : i32, i32
  }
  func.func @transform_7(%arg0: i32) -> (i32, i32) {
    %c0_i32 = arith.constant 0 : i32
    %c0_i32_0 = arith.constant 0 : i32
    return %arg0, %c0_i32 : i32, i32
  }
}

</mosaic_0001>

<bundles_post_ra>
// kernel: tpu_custom_call.1
= control target key start
LH: loop header
LB: loop body
LE: loop exit
PB: predicated region body
PF: predicated region fallthrough
CT: control target
= control target key end

     0   :  { %12 = vsyncpa [#allocation3], 0  ;;  %s1198_s0 = inlined_call_operand.hbm [shape: f32[32,32], index: 0, kind: input, shape index: {}]   ;;  %s1199_s1 = inlined_call_operand.hbm [shape: bf16[32,128], index: 1, kind: input, shape index: {}]   ;;  %s1200_s2 = inlined_call_operand.vmem [shape: f32[1,128], index: 2, kind: input, shape index: {}]   ;;  %s1201_s3 = inlined_call_operand.hbm [shape: bf16[128,128], index: 3, kind: input, shape index: {}]   ;;  %s1202_s4 = inlined_call_operand.vmem [shape: f32[1,128], index: 4, kind: input, shape index: {}]   ;;  %s1203_s5 = inlined_call_operand.hbm [shape: bf16[128,128], index: 5, kind: input, shape index: {}]   ;;  %s1204_s6 = inlined_call_operand.vmem [shape: f32[1,128], index: 6, kind: input, shape index: {}]   ;;  %s1205_s7 = inlined_call_operand.vmem [shape: f32[32,16], index: 7, kind: output, shape index: {}]  }
   0x1   :  { %14 = vsyncpa [#allocation3 + $0x1], 0 }
   0x2   :  { %15 = vsyncpa [#allocation5], 0 }
   0x3   :  { %16 = vsyncpa [#allocation8], 0  ;;  %s1063_s24 = smov 0   ;;  %s1065_s25 = smov 0  }
   0x4   :  { %s1067_s26 = smov 0   ;;  %s1069_s27 = smov 0  }
   0x5 LB: > { %s1206_s28 = sadd.s32 4294967295, %s1014_s27   ;;  %p42_p0 = scmp.ne.s32.totalorder %s1006_s25, %s1002_s24  ;;  %s1014_s27 = sphi %s1069_s27, %s1216_s27   ;;  %s1010_s26 = sphi %s1067_s26, %s1215_s26   ;;  %s1006_s25 = sphi %s1065_s25, %s1214_s25   ;;  %s1002_s24 = sphi %s1063_s24, %s1213_s24  }
   0x6   : > { %p1085_p1 = scmp.eq.s32.totalorder %s1206_s28, 0  ;;  %p666_p2 = scmp.ge.s32.totalorder %s1014_s27, 1 }
   0x7   : > { %p205_p3 = scmp.lt.s32.totalorder %s1014_s27, 3  ;;  %s216_s10 = sshll.u32 %s1199_s1, 4  ;;  %s217_s10 = int_to_ptr.hbm [resolvable:$true] %s216_s10 }
   0x8   : > { %p1093_p4 = por %p1085_p1, %p42_p0  ;;  %s1016_s12 = smov [#allocation4]  }
   0x9   : > { %p1100_p5 = pnand %p666_p2, %p205_p3  ;;  %s218_s13 = sshll.u32 %s1016_s12, 4  ;;  %s219_s13 = int_to_ptr.vmem [resolvable:$true] %s218_s13 }
   0xa   : > { %s233_s17 = sshll.u32 %s1201_s3, 4  ;;  %s1017_s18 = smov 64   ;;  %s234_s17 = int_to_ptr.hbm [resolvable:$true] %s233_s17 }
   0xb   : > { %p789_p6 = pneg %p1100_p5  ;;  %s1018_s19 = smov 4  }
   0xc   : > { %s1019_s20 = smov [#allocation6]   ;;  %s250_s24 = sshll.u32 %s1203_s5, 4  ;;  %s251_s24 = int_to_ptr.hbm [resolvable:$true] %s250_s24 }
   0xd   : > { %p1108_p7 = pnand %p789_p6, %p1085_p1  ;;  %s235_s21 = sshll.u32 %s1019_s20, 4  ;;  %s236_s21 = int_to_ptr.vmem [resolvable:$true] %s235_s21 }
   0xe   : > { %s1020_s8 = smov [#allocation7]   ;;  %s1123_s12 = sadd.s32 1, %s1014_s27  }
   0xf   : > { %792 = dma.hbm_to_vmem [thread:$0]  (!%p1108_p7), %s217_s10, 256, %s219_s13, [#allocation5], %s1017_s18, %s1017_s18, %s1018_s19  }
  0x10   : > { %795 = dma.hbm_to_vmem [thread:$0]  (!%p1108_p7), %s234_s17, 1024, %s236_s21, [#allocation5], %s1017_s18, %s1017_s18, %s1018_s19  }
  0x11   : > { %s252_s9 = sshll.u32 %s1020_s8, 4  ;;  %s26_s10 = ssub.s32 %s1014_s27, %s1123_s12  ;;  %s253_s9 = int_to_ptr.vmem [resolvable:$true] %s252_s9 }
  0x12   : > { %798 = dma.hbm_to_vmem [thread:$0]  (!%p1108_p7), %s251_s24, 1024, %s253_s9, [#allocation8], %s1017_s18, %s1017_s18, %s1018_s19  }
  0x13   : > { %s29_s13 = sadd.s32 1, %s1010_s26  ;;  %p27_p8 = scmp.eq.s32.totalorder %s26_s10, 0 }
  0x14   : > { %p36_p9 = scmp.ne.s32.totalorder %s1010_s26, %s1006_s25  ;;  %p37_p10 = scmp.eq.s32.totalorder %s1014_s27, 0 }
  0x15   : > { %p806_p11 = scmp.lt.s32.totalorder %s1014_s27, 2  ;;  %s269_s16 = sand.u32 1, %s1010_s26  }
  0x16   : > { %s1135_s15 = scalar_select %p27_p8, %s1010_s26, %s29_s13  }
  0x17   : > { %p38_p12 = por %p37_p10, %p36_p9  ;;  %s671_s17 = sshll.u32 %s269_s16, 4 }
  0x18   : > { %s756_s20 = sshll.u32 %s1014_s27, 4  ;;  %s273_s8 = scalar_lea.vmem [#allocation2], %s671_s17 }
  0x19   : > { %s278_s23 = scalar_lea.hbm %s1198_s0, %s756_s20  ;;  %s281_s14 = sshll.u32 %s273_s8, 4  ;;  %s282_s14 = int_to_ptr.vmem [resolvable:$true] %s281_s14 }
  0x1a   : > { %s279_s28 = sshll.u32 %s278_s23, 4  ;;  %p1142_p13 = pnand %p806_p11, %p38_p12  ;;  %s280_s28 = int_to_ptr.hbm [resolvable:$true] %s279_s28 }
  0x1b   : > { %s270_s19 = scalar_lea.sflag [#allocation3], %s269_s16  ;;  %s942_s24 = sshra.s32 %s280_s28, 4  ;;  %s943_s24 = int_to_ptr.hbm [resolvable:$true] %s942_s24 }
  0x1c   : > { %s944_s9 = scalar_lea.hbm %s943_s24, 16  ;;  %p946_p2 = pneg %p1142_p13 }
  0x1d   : > { %p945_p0 = scmp.ne.s32.totalorder %s943_s24, %s944_s9  ;;  %s949_s17 = scalar_lea.hbm %s1198_s0, 32 }
  0x1e   : > { %p950_p7 = scmp.lt.s32.totalorder %s943_s24, %s1198_s0  ;;  %p951_p8 = scmp.lt.s32.totalorder %s949_s17, %s944_s9 }
  0x1f   : > { %p947_p3 = pnand %p946_p2, %p945_p0 }
  0x20   : > { %p952_p9 = por %p951_p8, %p950_p7 }
  0x21   : > { %p948_p6 = pneg %p947_p3 }
  0x23   : > { %p953_p10 = pnand %p952_p9, %p948_p6 }
  0x25   : > { %956 = shalt.err (!%p953_p10)
}
  0x26   : > { %s1021_s16 = smov 128   ;;  %s1022_s22 = smov 8  }
  0x27   : > { %802 = dma.hbm_to_vmem [thread:$0]  (!%p1142_p13), %s280_s28, 256, %s282_s14, %s270_s19, %s1021_s16, %s1021_s16, %s1022_s22  }
  0x28   : > { %293 = sbr.rel (%p1100_p5) target bundleno = 481 (0x1e1), region = 48  ;;  %s295_s23 = sand.u32 (!%p1100_p5), 1, %s1006_s25  }
  0x29   : > { %s675_s8 = sshll.u32 (!%p1100_p5), %s295_s23, 4  ;;  %s296_s10 = scalar_lea.sflag (!%p1100_p5), [#allocation3], %s295_s23 }
  0x2a   : > { %s299_s13 = scalar_lea.vmem (!%p1100_p5), [#allocation2], %s675_s8 }
  0x2d   : > { %989 = dma.done.wait (%p1093_p4), %s296_s10, 256  }
  0x2e   : > { %991 = vsyncadd (%p1093_p4), %s296_s10, 4294967040 }
  0x2f   : > { %993 = dma.done.wait (%p1085_p1), [#allocation5], 1280  }
  0x30   : > { %995 = vsyncadd (%p1085_p1), [#allocation5], 4294966016 }
  0x31   : > { %997 = dma.done.wait (%p1085_p1), [#allocation8], 1024  }
  0x32   : > { %999 = vsyncadd (%p1085_p1), [#allocation8], 4294966272  ;;  %v758_v0 = vld [vmem:[#allocation4 + $0x8] sm:$0xff]  ;;  %v757_v1 = vld [vmem:[#allocation4] sm:$0xff]  ;;  %vm377_vm0 = vcmask 261120   ;;  %s1212_s14 = sadd.s32 4294967295, %s1014_s27  }
  0x33   : > { %v766_v2 = vld [vmem:[#allocation6 + $0x38] sm:$0xff]  ;;  %387 = vmatpush.bf16.msra.mxu0 %v758_v0  ;;  %v354_v3 = vld [vmem:[%s299_s13] sm:$0xff]  ;;  %v764_v7 = vld [vmem:[#allocation6 + $0x28] sm:$0xff]  ;;  %s679_s18 = sshll.u32 %s1212_s14, 1  ;;  %vm565_vm1 = vcmask 130048  }
  0x34   : > { %v355_v4 = vld [vmem:[%s299_s13 + $0x8] sm:$0xff]  ;;  %466 = vmatpush.bf16.msra.mxu1 %v766_v2  ;;  %v765_v5 = vld [vmem:[#allocation6 + $0x30] sm:$0xff]  ;;  %v763_v8 = vld [vmem:[#allocation6 + $0x20] sm:$0xff]  ;;  %p348_p1 = scmp.lt.s32.totalorder %s679_s18, 3 }
  0x35   : > { %v361_v6 = vpack.c.bf16 %v355_v4, %v354_v3  ;;  %v762_v9 = vld [vmem:[#allocation6 + $0x18] sm:$0xff]  ;;  %v761_v10 = vld [vmem:[#allocation6 + $0x10] sm:$0xff]  ;;  %v760_v11 = vld [vmem:[#allocation6 + $0x8] sm:$0xff] }
  0x36   : > { %v759_v12 = vld [vmem:[#allocation6] sm:$0xff]  ;;  %v774_v13 = vld [vmem:[#allocation7 + $0x38] sm:$0xff]  ;;  %v773_v14 = vld [vmem:[#allocation7 + $0x30] sm:$0xff]  ;;  %s1218_s18 = smov (!%p348_p1, %s679_s18), 3 }
  0x37   : > { %388 = vmatpush.bf16.msra.mxu0 %v757_v1  ;;  %551 = vmatpush.bf16.msra.mxu2 %v774_v13  ;;  %v772_v15 = vld [vmem:[#allocation7 + $0x28] sm:$0xff]  ;;  %v771_v16 = vld [vmem:[#allocation7 + $0x20] sm:$0xff]  ;;  %v849_v18 = vld [vmem:[%s1200_s2] ss:$0 sm:$0xff]  ;;  %s680_s19 = sshll.u32 %s1218_s18, 3 }
  0x38   : > { %467 = vmatpush.bf16.msra.mxu1 %v765_v5  ;;  %v770_v25 = vld [vmem:[#allocation7 + $0x18] sm:$0xff]  ;;  %v769_v26 = vld [vmem:[#allocation7 + $0x10] sm:$0xff]  ;;  %v768_v27 = vld [vmem:[#allocation7 + $0x8] sm:$0xff]  ;;  %s351_s21 = scalar_lea.vmem %s1205_s7, %s680_s19 }
  0x39   : > { %v767_v28 = vld [vmem:[#allocation7] sm:$0xff]  ;;  %v850_v30 = vld [vmem:[%s1202_s4] ss:$0 sm:$0xff] }
  0x3a   : > { %689 = vmatmul.msk.bf16.vlgmr.msra.gmra.mxu0 %vm377_vm0, %v361_v6  ;;  %v851_v37 = vld [vmem:[%s1204_s6] ss:$0 sm:$0xff] }
  0x3b   : > { %552 = vmatpush.bf16.msra.mxu2 %v773_v14 }
  0x3c   : > { %468 = vmatpush.bf16.msra.mxu1 %v764_v7 }
  0x3f   : > { %553 = vmatpush.bf16.msra.mxu2 %v772_v15 }
  0x40   : > { %469 = vmatpush.bf16.msra.mxu1 %v763_v8 }
  0x43   : > { %554 = vmatpush.bf16.msra.mxu2 %v771_v16 }
  0x44   : > { %470 = vmatpush.bf16.msra.mxu1 %v762_v9 }
  0x47   : > { %555 = vmatpush.bf16.msra.mxu2 %v770_v25 }
  0x48   : > { %471 = vmatpush.bf16.msra.mxu1 %v761_v10 }
  0x4b   : > { %556 = vmatpush.bf16.msra.mxu2 %v769_v26 }
  0x4c   : > { %472 = vmatpush.bf16.msra.mxu1 %v760_v11 }
  0x4f   : > { %557 = vmatpush.bf16.msra.mxu2 %v768_v27 }
  0x50   : > { %473 = vmatpush.bf16.msra.mxu1 %v759_v12 }
  0x53   : > { %558 = vmatpush.bf16.msra.mxu2 %v767_v28 }
  0xb7   : > { %v390_v17 = vpop.f32.mrf.mxu0 }
  0xb8   : > { %v391_v19 = vadd.f32 %v849_v18, %v390_v17 }
  0xba   : > { %v395_v22 = vmax.f32 %v391_v19, 0.0 }
  0xbf   : > { %v392_v20 = vpop.f32.mrf.mxu0 }
  0xc0   : > { %v393_v21 = vadd.f32 %v849_v18, %v392_v20 }
  0xc2   : > { %v396_v23 = vmax.f32 %v393_v21, 0.0 }
  0xc4   : > { %v414_v24 = vpack.c.bf16 %v396_v23, %v395_v22 }
  0xc6   : > { %474 = vmatmul.bf16.vlgmr.msra.gmra.mxu1 %v414_v24 }
 0x143   : > { %v475_v29 = vpop.f32.mrf.mxu1 }
 0x144   : > { %v476_v31 = vadd.f32 %v850_v30, %v475_v29 }
 0x146   : > { %v480_v34 = vmax.f32 %v476_v31, 0.0 }
 0x14b   : > { %v477_v32 = vpop.f32.mrf.mxu1 }
 0x14c   : > { %v478_v33 = vadd.f32 %v850_v30, %v477_v32 }
 0x14e   : > { %v481_v35 = vmax.f32 %v478_v33, 0.0 }
 0x150   : > { %v499_v36 = vpack.c.bf16 %v481_v35, %v480_v34 }
 0x152   : > { %559 = vmatmul.bf16.vlgmr.msra.gmra.mxu2 %v499_v36 }
 0x1d5   : > { %v560_v38 = vpop.f32.mrf.mxu2 }
 0x1d6   : > { %v561_v39 = vadd.f32 %v851_v37, %v560_v38 }
 0x1d8   : > { %566 = vst.msk [vmem:[%s351_s21] sm:$0xff] %vm565_vm1, %v561_v39 }
 0x1dd   : > { %v562_v40 = vpop.f32.mrf.mxu2 }
 0x1de   : > { %v563_v41 = vadd.f32 %v851_v37, %v562_v40 }
 0x1e0   : > { %567 = vst.msk [vmem:[%s351_s21 + $0x8] sm:$0xff] %vm565_vm1, %v563_v41 }
 0x1e1 PF: > { %p19_p4 = scmp.ge.s32.totalorder %s1123_s12, 4   ;;  %s1213_s24 = smov %s1006_s25 }
 0x1e2   : > { %s1214_s25 = smov %s1010_s26  ;;  %s1215_s26 = smov %s1135_s15 }
 0x1e3   : > { %s1216_s27 = smov %s1123_s12  ;;  %21 = sbr.rel (!%p19_p4) target bundleno = 5 (0x5), region = 100 }
 0x1e8   :  { %590 = vsyncpa [#allocation3], 1 }
 0x1e9   :  { %592 = vsyncpa [#allocation3 + $0x1], 1 }
 0x1ea   :  { %593 = vsyncpa [#allocation5], 1 }
 0x1eb   :  { %594 = vsyncpa [#allocation8], 1 }

</bundles_post_ra>
